<compile_context>
chip_gen: v7x
topology: tpu7x:2x2x1
jax: 0.10.0
libtpu: 0.0.40
codegen_flags: <defaults>
</compile_context>

<pallas_src>
import functools

import jax
import jax.numpy as jnp
from jax.experimental import pallas as pl
from jax.experimental.pallas import tpu as pltpu


def _round_up(x, m):
    return ((x + m - 1) // m) * m


def _discriminator_kernel(x_ref, w1_ref, b1_ref, w2_ref, b2_ref, w3_ref, b3_ref, out_ref):
    x = x_ref[...]                                                      # (TB, D_in) bf16

    # Layer 1: Linear (bf16 MXU, f32 acc) + bias + ReLU (f32 VPU)
    h1 = jnp.dot(x, w1_ref[...], preferred_element_type=jnp.float32) + b1_ref[...]
    h1 = jnp.maximum(h1, 0.0)

    # Layer 2: Linear (bf16 MXU, f32 acc) + bias + ReLU
    h2 = jnp.dot(h1.astype(jnp.bfloat16), w2_ref[...],
                 preferred_element_type=jnp.float32) + b2_ref[...]
    h2 = jnp.maximum(h2, 0.0)                                           # (TB, H) f32

    # Layer 3: N=1 output -> VPU multiply + cross-lane reduction (keeps MXU free),
    # bias added as an SMEM scalar.  Store lane-dense as a (1, 1, TB) slab.
    d = jnp.sum(h2 * w3_ref[...], axis=-1) + b3_ref[0, 0]               # (TB,)
    out_ref[...] = d.reshape(out_ref.shape).astype(out_ref.dtype)


def discriminator_forward(transition, params, tile_batch=None):
    """transition: (B, D_in) float32; params: dict of w1,b1,w2,b2,w3,b3. Returns (B, 1) f32."""
    B, D_in = transition.shape
    H = params["w1"].shape[1]

    # Batch tile: multiple of 16 (bf16 sublane packing), capped so the double-buffered
    # (TB, D_in) input + activations fit comfortably inside v7x's 64 MiB VMEM budget.
    if tile_batch is None:
        TB = min(512, _round_up(B, 16))
    else:
        TB = _round_up(tile_batch, 16)
    B_pad = _round_up(B, TB)
    num_tiles = B_pad // TB

    # bf16 operands for the MXU path (halves input/weight DMA bytes); biases stay f32.
    x = transition.astype(jnp.bfloat16)
    if B_pad != B:
        x = jnp.pad(x, ((0, B_pad - B), (0, 0)))
    w1 = params["w1"].astype(jnp.bfloat16)
    w2 = params["w2"].astype(jnp.bfloat16)
    b1 = params["b1"].reshape(1, H).astype(jnp.float32)
    b2 = params["b2"].reshape(1, H).astype(jnp.float32)
    w3 = params["w3"].reshape(1, H).astype(jnp.float32)   # row layout for the VPU reduction
    b3 = params["b3"].reshape(1, 1).astype(jnp.float32)   # scalar, lives in SMEM

    out = pl.pallas_call(
        _discriminator_kernel,
        out_shape=jax.ShapeDtypeStruct((num_tiles, 1, TB), jnp.float32),
        grid=(num_tiles,),
        in_specs=[
            pl.BlockSpec((TB, D_in), lambda i: (i, 0)),     # x: batch-tiled
            pl.BlockSpec((D_in, H), lambda i: (0, 0)),      # w1: resident
            pl.BlockSpec((1, H), lambda i: (0, 0)),         # b1: resident
            pl.BlockSpec((H, H), lambda i: (0, 0)),         # w2: resident
            pl.BlockSpec((1, H), lambda i: (0, 0)),         # b2: resident
            pl.BlockSpec((1, H), lambda i: (0, 0)),         # w3 row: resident
            pl.BlockSpec(memory_space=pltpu.MemorySpace.SMEM),  # b3 scalar
        ],
        out_specs=pl.BlockSpec((1, 1, TB), lambda i: (i, 0, 0)),  # lane-dense output slab
        compiler_params=pltpu.CompilerParams(
            dimension_semantics=("parallel",),
        ),
    )(x, w1, b1, w2, b2, w3, b3)

    # (num_tiles, 1, TB) -> flat padded batch -> (B, 1)
    d = out.reshape(B_pad)[:B].reshape(B, 1)
    return d


def init_params(key, input_dim, hidden_dim):
    """Deterministic synthetic init (stand-in for utils.weight_init).

    PyTorch nn.Linear stores weight as (out, in); we keep the transposed
    (in, out) layout so the kernel does x @ W directly. Biases as (1, out).
    """
    k1, k2, k3 = jax.random.split(key, 3)
    s1 = 1.0 / jnp.sqrt(jnp.float32(input_dim))
    s2 = 1.0 / jnp.sqrt(jnp.float32(hidden_dim))
    params = {
        "w1": jax.random.normal(k1, (input_dim, hidden_dim), jnp.float32) * s1,
        "b1": jnp.zeros((1, hidden_dim), jnp.float32),
        "w2": jax.random.normal(k2, (hidden_dim, hidden_dim), jnp.float32) * s2,
        "b2": jnp.zeros((1, hidden_dim), jnp.float32),
        "w3": jax.random.normal(k3, (hidden_dim, 1), jnp.float32) * s2,
        "b3": jnp.zeros((1, 1), jnp.float32),
    }
    return params


# TODO(synk): spectral_norm_bool=True path (power-iteration weight normalization)
# is a training-time reparameterization; only the plain-Linear forward is implemented.
# TODO(synk): dist='binary' branch returns a Bernoulli distribution wrapper; the
# kernel returns the raw logits d, which is the dist=None behavior.


if __name__ == "__main__":
    key = jax.random.PRNGKey(0)
    k_in, k_params = jax.random.split(key)

    batch = 8
    input_net_dim = 32     # e.g. concatenated (obs, action) transition features
    hidden_dim = 32

    transition = jax.random.normal(k_in, (batch, input_net_dim), jnp.float32)
    params = init_params(k_params, input_net_dim, hidden_dim)

    fwd = jax.jit(functools.partial(discriminator_forward))
    d = fwd(transition, params)
    d = jax.block_until_ready(d)

    # Pure-JAX f32 reference for a sanity check (kernel uses bf16 MXU operands with
    # f32 accumulation, so allow bf16-level tolerance).
    h1 = jnp.maximum(transition @ params["w1"] + params["b1"], 0.0)
    h2 = jnp.maximum(h1 @ params["w2"] + params["b2"], 0.0)
    d_ref = h2 @ params["w3"] + params["b3"]
    assert d.shape == (batch, 1)
    assert jnp.allclose(d, d_ref, atol=5e-2, rtol=5e-2), (d, d_ref)

    print("KERNEL_OK")
</pallas_src>

<mosaic_0001>
module attributes {stable_mosaic.version = 11 : i64} {
  func.func @_discriminator_kernel(%arg0: i32, %arg1: memref<16x32xbf16, #tpu.memory_space<vmem>>, %arg2: memref<32x32xbf16, #tpu.memory_space<vmem>>, %arg3: memref<1x32xf32, #tpu.memory_space<vmem>>, %arg4: memref<32x32xbf16, #tpu.memory_space<vmem>>, %arg5: memref<1x32xf32, #tpu.memory_space<vmem>>, %arg6: memref<1x32xf32, #tpu.memory_space<vmem>>, %arg7: memref<1x1xf32, #tpu.memory_space<smem>>, %arg8: memref<1x1x16xf32, #tpu.memory_space<vmem>>) attributes {dimension_semantics = [#tpu.dimension_semantics<parallel>], iteration_bounds = array<i64: 1>, scalar_prefetch = 0 : i64, scratch_operands = 0 : i64, tpu.core_type = #tpu.core_type<tc>, window_params = [{transform_indices = @transform_0, window_bounds = array<i64: 16, 32>}, {pipeline_mode = #tpu.pipeline_mode<synchronous>, transform_indices = @transform_1, window_bounds = array<i64: 32, 32>}, {pipeline_mode = #tpu.pipeline_mode<synchronous>, transform_indices = @transform_2, window_bounds = array<i64: 1, 32>}, {pipeline_mode = #tpu.pipeline_mode<synchronous>, transform_indices = @transform_3, window_bounds = array<i64: 32, 32>}, {pipeline_mode = #tpu.pipeline_mode<synchronous>, transform_indices = @transform_4, window_bounds = array<i64: 1, 32>}, {pipeline_mode = #tpu.pipeline_mode<synchronous>, transform_indices = @transform_5, window_bounds = array<i64: 1, 32>}, {transform_indices = @transform_6, window_bounds = array<i64: 1, 1>}, {transform_indices = @transform_7, window_bounds = array<i64: 1, 1, 16>}]} {
    %c0 = arith.constant 0 : index
    %c0_0 = arith.constant 0 : index
    %0 = vector.load %arg1[%c0, %c0_0] : memref<16x32xbf16, #tpu.memory_space<vmem>>, vector<16x32xbf16>
    %c0_1 = arith.constant 0 : index
    %c0_2 = arith.constant 0 : index
    %1 = vector.load %arg2[%c0_1, %c0_2] : memref<32x32xbf16, #tpu.memory_space<vmem>>, vector<32x32xbf16>
    %cst = arith.constant dense<0.000000e+00> : vector<16x32xf32>
    %2 = tpu.matmul %0, %1, %cst {dimension_numbers = #tpu.dot_dimension_numbers<[1], [0], [0], [1], [0, 0, 1, 1], [], []>} : vector<16x32xbf16>, vector<32x32xbf16>, vector<16x32xf32> -> vector<16x32xf32>
    %c0_3 = arith.constant 0 : index
    %c0_4 = arith.constant 0 : index
    %3 = vector.load %arg3[%c0_3, %c0_4] : memref<1x32xf32, #tpu.memory_space<vmem>>, vector<1x32xf32>
    %4 = vector.broadcast %3 : vector<1x32xf32> to vector<16x32xf32>
    %5 = arith.addf %2, %4 : vector<16x32xf32>
    %cst_5 = arith.constant 0.000000e+00 : f32
    %6 = vector.broadcast %cst_5 : f32 to vector<16x32xf32>
    %7 = arith.maximumf %5, %6 : vector<16x32xf32>
    %8 = arith.truncf %7 : vector<16x32xf32> to vector<16x32xbf16>
    %c0_6 = arith.constant 0 : index
    %c0_7 = arith.constant 0 : index
    %9 = vector.load %arg4[%c0_6, %c0_7] : memref<32x32xbf16, #tpu.memory_space<vmem>>, vector<32x32xbf16>
    %cst_8 = arith.constant dense<0.000000e+00> : vector<16x32xf32>
    %10 = tpu.matmul %8, %9, %cst_8 {dimension_numbers = #tpu.dot_dimension_numbers<[1], [0], [0], [1], [0, 0, 1, 1], [], []>} : vector<16x32xbf16>, vector<32x32xbf16>, vector<16x32xf32> -> vector<16x32xf32>
    %c0_9 = arith.constant 0 : index
    %c0_10 = arith.constant 0 : index
    %11 = vector.load %arg5[%c0_9, %c0_10] : memref<1x32xf32, #tpu.memory_space<vmem>>, vector<1x32xf32>
    %12 = vector.broadcast %11 : vector<1x32xf32> to vector<16x32xf32>
    %13 = arith.addf %10, %12 : vector<16x32xf32>
    %cst_11 = arith.constant 0.000000e+00 : f32
    %14 = vector.broadcast %cst_11 : f32 to vector<16x32xf32>
    %15 = arith.maximumf %13, %14 : vector<16x32xf32>
    %c0_12 = arith.constant 0 : index
    %c0_13 = arith.constant 0 : index
    %16 = vector.load %arg6[%c0_12, %c0_13] : memref<1x32xf32, #tpu.memory_space<vmem>>, vector<1x32xf32>
    %17 = vector.broadcast %16 : vector<1x32xf32> to vector<16x32xf32>
    %18 = arith.mulf %15, %17 : vector<16x32xf32>
    %cst_14 = arith.constant dense<0.000000e+00> : vector<16xf32>
    %19 = vector.multi_reduction <add>, %18, %cst_14 [1] : vector<16x32xf32> to vector<16xf32>
    %c0_15 = arith.constant 0 : index
    %c0_16 = arith.constant 0 : index
    %20 = memref.load %arg7[%c0_15, %c0_16] : memref<1x1xf32, #tpu.memory_space<smem>>
    %21 = vector.broadcast %20 : f32 to vector<16xf32>
    %22 = arith.addf %19, %21 : vector<16xf32>
    %23 = vector.shape_cast %22 : vector<16xf32> to vector<1x1x16xf32>
    %c0_17 = arith.constant 0 : index
    %c0_18 = arith.constant 0 : index
    %c0_19 = arith.constant 0 : index
    %24 = vector.load %arg8[%c0_17, %c0_18, %c0_19] : memref<1x1x16xf32, #tpu.memory_space<vmem>>, vector<1x1x16xf32>
    tpu.vector_store %arg8[%c0_17, %c0_18, %c0_19], %23 {strides = array<i32>} : memref<1x1x16xf32, #tpu.memory_space<vmem>>, vector<1x1x16xf32>,
    return
  }
  func.func @transform_0(%arg0: i32) -> (i32, i32) {
    %c0_i32 = arith.constant 0 : i32
    %c0_i32_0 = arith.constant 0 : i32
    return %arg0, %c0_i32 : i32, i32
  }
  func.func @transform_1(%arg0: i32) -> (i32, i32) {
    %c0_i32 = arith.constant 0 : i32
    %c0_i32_0 = arith.constant 0 : i32
    %c0_i32_1 = arith.constant 0 : i32
    return %c0_i32, %c0_i32_0 : i32, i32
  }
  func.func @transform_2(%arg0: i32) -> (i32, i32) {
    %c0_i32 = arith.constant 0 : i32
    %c0_i32_0 = arith.constant 0 : i32
    %c0_i32_1 = arith.constant 0 : i32
    return %c0_i32, %c0_i32_0 : i32, i32
  }
  func.func @transform_3(%arg0: i32) -> (i32, i32) {
    %c0_i32 = arith.constant 0 : i32
    %c0_i32_0 = arith.constant 0 : i32
    %c0_i32_1 = arith.constant 0 : i32
    return %c0_i32, %c0_i32_0 : i32, i32
  }
  func.func @transform_4(%arg0: i32) -> (i32, i32) {
    %c0_i32 = arith.constant 0 : i32
    %c0_i32_0 = arith.constant 0 : i32
    %c0_i32_1 = arith.constant 0 : i32
    return %c0_i32, %c0_i32_0 : i32, i32
  }
  func.func @transform_5(%arg0: i32) -> (i32, i32) {
    %c0_i32 = arith.constant 0 : i32
    %c0_i32_0 = arith.constant 0 : i32
    %c0_i32_1 = arith.constant 0 : i32
    return %c0_i32, %c0_i32_0 : i32, i32
  }
  func.func @transform_6(%arg0: i32) -> (i32, i32) {
    %c0_i32 = arith.constant 0 : i32
    %c0_i32_0 = arith.constant 0 : i32
    %c0_i32_1 = arith.constant 0 : i32
    return %c0_i32, %c0_i32_0 : i32, i32
  }
  func.func @transform_7(%arg0: i32) -> (i32, i32, i32) {
    %c0_i32 = arith.constant 0 : i32
    %c0_i32_0 = arith.constant 0 : i32
    %c0_i32_1 = arith.constant 0 : i32
    return %arg0, %c0_i32, %c0_i32_0 : i32, i32, i32
  }
}

</mosaic_0001>

<bundles_post_ra>
// kernel: discriminator_forward.1
= control target key start
LH: loop header
LB: loop body
LE: loop exit
PB: predicated region body
PF: predicated region fallthrough
CT: control target
= control target key end

     0   :  { %v255_v0 = vmov 0.0   ;;  %vm256_vm0 = vmmov 0   ;;  %vm58_vm1 = vcmask 261120   ;;  %v196_v30 = vlaneseq  ;;  %s331_s1 = inlined_call_operand.vmem [shape: bf16[32,32], index: 1, kind: input, shape index: {}]   ;;  %s332_s0 = inlined_call_operand.vmem [shape: bf16[16,32], index: 0, kind: input, shape index: {}]   ;;  %s333_s3 = inlined_call_operand.vmem [shape: bf16[32,32], index: 3, kind: input, shape index: {}]   ;;  %s334_s2 = inlined_call_operand.vmem [shape: f32[1,32], index: 2, kind: input, shape index: {}]   ;;  %s335_s4 = inlined_call_operand.vmem [shape: f32[1,32], index: 4, kind: input, shape index: {}]   ;;  %s336_s5 = inlined_call_operand.vmem [shape: f32[1,32], index: 5, kind: input, shape index: {}]   ;;  %s337_s6 = inlined_call_operand.<no memory space> [shape: f32[1,1], index: 6, kind: input, shape index: {}]   ;;  %s338_s7 = inlined_call_operand.vmem [shape: f32[1,1,16], index: 7, kind: output, shape index: {}]  }
   0x1   :  { %232 = vmatprep.subr.bf16.mxu0 %v255_v0  ;;  %v250_v1 = vld [vmem:[%s331_s1] sm:$0xff]   ;;  %236 = vmatprep.mubr.msk.bf16.mxu0 %vm256_vm0, %v255_v0  ;;  %v251_v2 = vld [vmem:[%s331_s1 + $0x8] sm:$0xff]   ;;  %v191_v34 = vstv %s337_s6  ;;  %vm207_vm2 = vcmask 130112   ;;  %vm210_vm3 = vcmask 122880  }
   0x2   :  { %240 = vmatprep.subr.bf16.mxu1 %v255_v0  ;;  %244 = vmatprep.mubr.msk.bf16.mxu1 %vm256_vm0, %v255_v0  ;;  %v252_v3 = vld [vmem:[%s332_s0] sm:$0xff]   ;;  %v254_v5 = vld [vmem:[%s333_s3 + $0x8] sm:$0xff]   ;;  %v197_v31 = vand.u32 127, %v196_v30  ;;  %v199_v32 = vshrl.u32 %v196_v30, 7 }
   0x3   :  { %233 = vmatpush3.bf16.msra.mxu0 %v250_v1  ;;  %v253_v4 = vld [vmem:[%s333_s3] sm:$0xff]  }
   0x4   :  { %234 = vmatprep.subr.bf16.mxu0 %v255_v0  ;;  %241 = vmatpush3.bf16.msra.mxu1 %v253_v4  ;;  %v216_v6 = vld [vmem:[%s334_s2] ss:$0 sm:$0xff]  ;;  %v202_v33 = vadd.s32 4294967288, %v197_v31  ;;  %v200_v36 = vsub.s32 %v197_v31, %v199_v32 }
   0x5   :  { %242 = vmatprep.subr.bf16.mxu1 %v255_v0  ;;  %v221_v16 = vld [vmem:[%s335_s4] ss:$0 sm:$0xff] }
   0x6   :  { %v225_v21 = vld [vmem:[%s336_s5] ss:$0 sm:$0xff]  ;;  %v205_v38 = vsub.s32 %v202_v33, %v199_v32 }
   0x7   :  { %235 = vmatpush3.bf16.msra.mxu0 %v251_v2 }
   0x8   :  { %243 = vmatpush3.bf16.msra.mxu1 %v254_v5 }
   0xa   :  { %237 = vmatmul.mubr.msk.bf16.vlgmr.msra.gmra.mrb[0].mxu0 %vm58_vm1, %v252_v3 }
  0xdd   :  { %v96_v7 = vpop.f32.mrb[0].mxu0 }
  0xde   :  { %v97_v8 = vadd.f32 %v216_v6, %v96_v7  ;;  %v238_v9 = vpop.f32.mrb[1].mxu0 }
  0xdf   :  { %v99_v10 = vpop.f32.mrb[2].mxu0 }
  0xe0   :  { %v100_v11 = vadd.f32 %v216_v6, %v99_v10  ;;  %v239_v12 = vpop.f32.mrb[3].mxu0  ;;  %v103_v13 = vmax.f32 %v97_v8, 0.0 }
  0xe2   :  { %v104_v14 = vmax.f32 %v100_v11, 0.0 }
  0xe4   :  { %v105_v15 = vpack.c.bf16 %v104_v14, %v103_v13 }
  0xe6   :  { %245 = vmatmul.mubr.msk.bf16.vlgmr.msra.gmra.mrb[0].mxu1 %vm58_vm1, %v105_v15 }
 0x1b9   :  { %v166_v17 = vpop.f32.mrb[0].mxu1 }
 0x1ba   :  { %v167_v18 = vadd.f32 %v221_v16, %v166_v17  ;;  %v246_v19 = vpop.f32.mrb[1].mxu1 }
 0x1bb   :  { %v169_v20 = vpop.f32.mrb[2].mxu1 }
 0x1bc   :  { %v173_v22 = vmax.f32 %v167_v18, 0.0  ;;  %v170_v23 = vadd.f32 %v221_v16, %v169_v20  ;;  %v247_v24 = vpop.f32.mrb[3].mxu1 }
 0x1be   :  { %v174_v25 = vmax.f32 %v170_v23, 0.0  ;;  %v182_v26 = vmul.f32 %v225_v21, %v173_v22 }
 0x1c0   :  { %v184_v27 = vsel %vm58_vm1, %v182_v26, 0.0  ;;  %v183_v28 = vmul.f32 %v225_v21, %v174_v25 }
 0x1c1   :  { %185 = vadd.xlane.f32.xlu0 %v184_v27 }
 0x1c2   :  { %v187_v29 = vsel %vm58_vm1, %v183_v28, 0.0 }
 0x1c5   :  { %188 = vadd.xlane.f32.xlu0 %v187_v29 }
 0x24e   :  { %v186_v35 = vpop.xlane.xlu0 %185 }
 0x24f   :  { %v192_v37 = vadd.f32 %v191_v34, %v186_v35 }
 0x251   :  { %v201_v41 = vrot.slane %v192_v37, %v200_v36 }
 0x252   :  { %v189_v39 = vpop.xlane.xlu0 %188 }
 0x253   :  { %v193_v40 = vadd.f32 %v191_v34, %v189_v39 }
 0x255   :  { %v206_v42 = vrot.slane %v193_v40, %v205_v38 }
 0x257   :  { %v208_v43 = vsel %vm207_vm2, %v206_v42, %v201_v41 }
 0x258   :  { %211 = vst.msk [vmem:[%s338_s7] sm:$0x1] %vm210_vm3, %v208_v43 }

</bundles_post_ra>
